<compile_context>
chip_gen: v5e
topology: v5e:2x2
jax: 0.10.0
libtpu: 0.0.40
codegen_flags: <defaults>
</compile_context>

<pallas_src>
import numpy as np
import jax
import jax.numpy as jnp
from jax.experimental import pallas as pl
from jax.experimental.pallas import tpu as pltpu


# ----------------------------- Fused Pallas kernel -----------------------------

def fused_residual_kernel(x_ref, add_ref, vec_ref, gmat_ref, m1_ref, m2_ref, o_ref):
    # x_ref:    (Bt, H, WC)  lane-dense activation block (Bt batch elems per grid step)
    # add_ref:  (Bt, 1, WC)  summed time+label adapter output (per-channel, lane-tiled)
    # vec_ref:  (8, WC)      packed lane vectors: [gn1_g, gn1_b, cb1, gn2_g, gn2_b, cb2, 0, 0]
    # gmat_ref: (WC, WC)     group-mean matrix (reduce over W & channels-in-group + bcast), f32
    # m*_ref:   (3*WC, WC)   banded conv weight matrices (kh taps stacked along K), bf16
    Bt, H, WC = x_ref.shape
    x = x_ref[...]                                                 # (Bt, H, WC) f32

    def silu(v):
        # sigmoid(x) = 0.5*(1+tanh(x/2)): tanh lands on the EUP slot, no VALU divide.
        return v * (0.5 * (jnp.tanh(0.5 * v) + 1.0))

    def groupnorm(h, gamma, beta):
        # Single-pass stats; group reduce folded into ONE constant matmul (f32 stats).
        s1 = jnp.mean(h, axis=1)                                   # (Bt, WC) per-lane E[x]
        s2 = jnp.mean(h * h, axis=1)                               # (Bt, WC) per-lane E[x^2]
        stats = jnp.concatenate([s1, s2], axis=0)                  # (2*Bt, WC)
        g = jnp.dot(stats, gmat_ref[...],
                    preferred_element_type=jnp.float32)            # group-reduced + lane-bcast
        mu = g[:Bt]                                                # (Bt, WC)
        var = g[Bt:] - mu * mu
        inv = jax.lax.rsqrt(var + 1e-5)
        return (h - mu[:, None, :]) * inv[:, None, :] * gamma + beta

    def conv3x3(h, m_ref, bias):
        # H padding handled in vregs: roll +/-1 along rows, zero the wrap rows with an
        # iota mask (also masks the batch-block boundaries).  W padding + kw taps live in
        # the banded matrices; the 3 kh taps are one fused K=3*WC matmul.
        hr = h.reshape(Bt * H, WC)
        row = jax.lax.broadcasted_iota(jnp.int32, (Bt * H, WC), 0) % H
        up = jnp.where(row >= 1, pltpu.roll(hr, shift=1, axis=0), 0.0)            # h[i-1]
        dn = jnp.where(row <= H - 2, pltpu.roll(hr, shift=Bt * H - 1, axis=0), 0.0)  # h[i+1]
        lhs = jnp.concatenate([up, hr, dn], axis=1).astype(jnp.bfloat16)          # (Bt*H, 3*WC)
        acc = jnp.dot(lhs, m_ref[...], preferred_element_type=jnp.float32)        # (Bt*H, WC)
        return acc.reshape(Bt, H, WC) + bias

    g1, gb1, cb1 = vec_ref[0:1, :], vec_ref[1:2, :], vec_ref[2:3, :]
    g2, gb2, cb2 = vec_ref[3:4, :], vec_ref[4:5, :], vec_ref[5:6, :]

    # block1: SiLU -> (Dropout=id) -> GN -> conv3x3
    h = conv3x3(groupnorm(silu(x), g1, gb1), m1_ref, cb1)
    # time + label adapter add (per-channel, broadcast over H rows)
    h = h + add_ref[...]
    # block2 + residual
    h = conv3x3(groupnorm(silu(h), g2, gb2), m2_ref, cb2)
    o_ref[...] = h + x


# ----------------------------- One-time constant building (hoisted) -----------------------------

def _conv_weight_to_lane_mats(w_hwio, W):
    # w: (3, 3, Cin, Cout) HWIO -> (3*W*Cin, W*Cout) banded matrix, kh taps stacked along K.
    # M[kh*W*Ci + w_in*Ci + ci, w_out*Co + co] = w[kh, w_in-w_out+1, ci, co] (0 outside the band),
    # which also implements the zero padding along W.
    _, _, Ci, Co = w_hwio.shape
    wi = jnp.arange(W)
    dx = wi[:, None] - wi[None, :] + 1                             # (W_in, W_out)
    valid = ((dx >= 0) & (dx <= 2)).astype(w_hwio.dtype)
    g = w_hwio[:, jnp.clip(dx, 0, 2), :, :]                        # (3, W_in, W_out, Ci, Co)
    g = g * valid[None, :, :, None, None]
    m = jnp.transpose(g, (0, 1, 3, 2, 4)).reshape(3, W * Ci, W * Co)
    return m.reshape(3 * W * Ci, W * Co)


def _group_lane_mat(W, C, group_size):
    # (W*C, W*C): averages per-lane (already H-averaged) stats over the W*group_size lanes of
    # each group and broadcasts the result back to every lane of that group.
    gid = np.tile(np.arange(C) // group_size, W)                   # lane w*C+c -> c//group_size
    same = (gid[:, None] == gid[None, :]).astype(np.float32)
    return jnp.asarray(same / (W * group_size))


def _tile_lane(v, W):
    # (C,) or (1, C) -> (1, W*C) with lane index w*C + c carrying v[c]
    return jnp.tile(jnp.asarray(v, jnp.float32).reshape(1, -1), (1, W))


def prepare_residual_layer(p, W, C):
    """Build lane-layout kernel constants ONCE (model load time), not per forward call."""
    WC = W * C
    vec = jnp.concatenate([
        _tile_lane(p["gn1_gamma"], W), _tile_lane(p["gn1_beta"], W), _tile_lane(p["conv1_b"], W),
        _tile_lane(p["gn2_gamma"], W), _tile_lane(p["gn2_beta"], W), _tile_lane(p["conv2_b"], W),
        jnp.zeros((2, WC), jnp.float32),
    ], axis=0)                                                     # (8, WC): single DMA tile
    return {
        "gmat": _group_lane_mat(W, C, 4),                                           # f32 stats
        "m1": _conv_weight_to_lane_mats(p["conv1_w"], W).astype(jnp.bfloat16),      # bf16 MXU
        "m2": _conv_weight_to_lane_mats(p["conv2_w"], W).astype(jnp.bfloat16),
        "vec": vec,
        # adapter params (used by tiny plain-JAX matmuls in the wrapper)
        "t_w1": p["t_w1"], "t_b1": p["t_b1"], "t_w2": p["t_w2"], "t_b2": p["t_b2"],
        "y_w1": p["y_w1"], "y_b1": p["y_b1"], "y_w2": p["y_w2"], "y_b2": p["y_b2"],
    }


# ----------------------------- Forward pass -----------------------------

@jax.jit
def residual_layer_forward(x_nchw, t_embed, y_embed, prep):
    # NCHW (PyTorch interface) -> NHWC lane-dense.  In a full model, keep NHWC end-to-end
    # instead of transposing around every layer.
    x = jnp.transpose(x_nchw, (0, 2, 3, 1)).astype(jnp.float32)
    bs, H, W, C = x.shape
    WC = W * C
    x_lane = x.reshape(bs, H, WC)

    # Time / label adapters: tiny matmuls, plain JAX (XLA overlaps them with the kernel).
    def adapter(e, w1, b1, w2, b2):
        h = e @ w1 + b1                                            # Dropout = identity (eval)
        return jax.nn.silu(h) @ w2 + b2

    add_c = (adapter(t_embed, prep["t_w1"], prep["t_b1"], prep["t_w2"], prep["t_b2"])
             + adapter(y_embed, prep["y_w1"], prep["y_b1"], prep["y_w2"], prep["y_b2"]))  # (bs, C)
    add_lane = jnp.tile(add_c, (1, W)).reshape(bs, 1, WC)

    # Fold the whole batch into one grid step (amortize ~0.35us per-step overhead, bigger M
    # for the MXU).  On v7x choose Bt = bs // 2 so both TensorCores get a parallel step.
    Bt = bs
    grid = (bs // Bt,)

    conv_flops = 2 * (2 * bs * H * (3 * WC) * WC)                  # 2 fused banded convs
    gn_flops = 2 * (2 * (2 * bs) * WC * WC)                        # 2 group-reduce matmuls
    ew_flops = 24 * bs * H * WC                                    # SiLU / GN / adds (approx)
    cost = pl.CostEstimate(
        flops=int(conv_flops + gn_flops + ew_flops),
        transcendentals=int(2 * bs * H * WC + 2 * bs * WC),
        bytes_accessed=int(2 * bs * H * WC * 4 + bs * WC * 4 + 8 * WC * 4
                           + WC * WC * 4 + 2 * (3 * WC) * WC * 2),
    )

    out_lane = pl.pallas_call(
        fused_residual_kernel,
        out_shape=jax.ShapeDtypeStruct((bs, H, WC), jnp.float32),
        grid=grid,
        in_specs=[
            pl.BlockSpec((Bt, H, WC), lambda b: (b, 0, 0)),        # x (lane-dense)
            pl.BlockSpec((Bt, 1, WC), lambda b: (b, 0, 0)),        # adapter add
            pl.BlockSpec((8, WC), lambda b: (0, 0)),               # packed gamma/beta/bias rows
            pl.BlockSpec((WC, WC), lambda b: (0, 0)),              # group matrix (f32)
            pl.BlockSpec((3 * WC, WC), lambda b: (0, 0)),          # conv1 banded mat (bf16)
            pl.BlockSpec((3 * WC, WC), lambda b: (0, 0)),          # conv2 banded mat (bf16)
        ],
        out_specs=pl.BlockSpec((Bt, H, WC), lambda b: (b, 0, 0)),
        compiler_params=pltpu.CompilerParams(
            dimension_semantics=("parallel",),
            vmem_limit_bytes=32 * 1024 * 1024,
        ),
        cost_estimate=cost,
    )(x_lane, add_lane, prep["vec"], prep["gmat"], prep["m1"], prep["m2"])

    out = out_lane.reshape(bs, H, W, C)
    return jnp.transpose(out, (0, 3, 1, 2))                        # back to NCHW


# ----------------------------- Pure-JAX reference -----------------------------

def ref_forward(x_nchw, t_embed, y_embed, p):
    x = jnp.transpose(x_nchw, (0, 2, 3, 1)).astype(jnp.float32)
    bs, H, W, C = x.shape
    G = C // 4

    def silu(v):
        return v * jax.nn.sigmoid(v)

    def gn(v, gamma, beta):
        vr = v.reshape(bs, H, W, G, 4)
        mu = vr.mean(axis=(1, 2, 4), keepdims=True)
        var = ((vr - mu) ** 2).mean(axis=(1, 2, 4), keepdims=True)
        vn = ((vr - mu) / jnp.sqrt(var + 1e-5)).reshape(bs, H, W, C)
        return vn * gamma.reshape(1, 1, 1, C) + beta.reshape(1, 1, 1, C)

    def conv(v, w, b):
        return jax.lax.conv_general_dilated(
            v, w, window_strides=(1, 1), padding=((1, 1), (1, 1)),
            dimension_numbers=("NHWC", "HWIO", "NHWC")) + b.reshape(1, 1, 1, C)

    def adapter(e, w1, b1, w2, b2):
        return silu(e @ w1 + b1) @ w2 + b2

    res = x
    h = conv(gn(silu(x), p["gn1_gamma"], p["gn1_beta"]), p["conv1_w"], p["conv1_b"])
    h = h + adapter(t_embed, p["t_w1"], p["t_b1"], p["t_w2"], p["t_b2"])[:, None, None, :]
    h = h + adapter(y_embed, p["y_w1"], p["y_b1"], p["y_w2"], p["y_b2"])[:, None, None, :]
    h = conv(gn(silu(h), p["gn2_gamma"], p["gn2_beta"]), p["conv2_w"], p["conv2_b"])
    out = h + res
    return jnp.transpose(out, (0, 3, 1, 2))


# ----------------------------- Main -----------------------------

if __name__ == "__main__":
    bs, C, H, W = 2, 8, 16, 16            # W*C = 128 -> exactly one full lane row
    t_dim, y_dim = 16, 16
    f32 = jnp.float32
    key = jax.random.PRNGKey(0)
    ks = jax.random.split(key, 16)

    p = {
        "gn1_gamma": jnp.ones((1, C), f32),
        "gn1_beta": jnp.zeros((1, C), f32),
        "conv1_w": 0.1 * jax.random.normal(ks[0], (3, 3, C, C), f32),
        "conv1_b": 0.1 * jax.random.normal(ks[1], (1, C), f32),
        "gn2_gamma": jnp.ones((1, C), f32),
        "gn2_beta": jnp.zeros((1, C), f32),
        "conv2_w": 0.1 * jax.random.normal(ks[2], (3, 3, C, C), f32),
        "conv2_b": 0.1 * jax.random.normal(ks[3], (1, C), f32),
        "t_w1": 0.1 * jax.random.normal(ks[4], (t_dim, t_dim), f32),
        "t_b1": 0.1 * jax.random.normal(ks[5], (1, t_dim), f32),
        "t_w2": 0.1 * jax.random.normal(ks[6], (t_dim, C), f32),
        "t_b2": 0.1 * jax.random.normal(ks[7], (1, C), f32),
        "y_w1": 0.1 * jax.random.normal(ks[8], (y_dim, y_dim), f32),
        "y_b1": 0.1 * jax.random.normal(ks[9], (1, y_dim), f32),
        "y_w2": 0.1 * jax.random.normal(ks[10], (y_dim, C), f32),
        "y_b2": 0.1 * jax.random.normal(ks[11], (1, C), f32),
    }

    x = jax.random.normal(ks[12], (bs, C, H, W), f32)              # NCHW like PyTorch
    t_embed = jax.random.normal(ks[13], (bs, t_dim), f32)
    y_embed = jax.random.normal(ks[14], (bs, y_dim), f32)

    prep = prepare_residual_layer(p, W, C)                         # hoisted, once per model
    out = jax.block_until_ready(residual_layer_forward(x, t_embed, y_embed, prep))
    ref = jax.block_until_ready(ref_forward(x, t_embed, y_embed, p))
    # Tolerance reflects bf16 MXU operands for the conv matmuls (f32 accumulate, f32 GN stats).
    np.testing.assert_allclose(np.asarray(out), np.asarray(ref), rtol=2e-2, atol=3e-2)
    print("KERNEL_OK")
</pallas_src>

<mosaic_0001>
module attributes {stable_mosaic.version = 11 : i64} {
  func.func @fused_residual_kernel(%arg0: i32, %arg1: memref<2x16x128xf32, #tpu.memory_space<vmem>>, %arg2: memref<2x1x128xf32, #tpu.memory_space<vmem>>, %arg3: memref<8x128xf32, #tpu.memory_space<vmem>>, %arg4: memref<128x128xf32, #tpu.memory_space<vmem>>, %arg5: memref<384x128xbf16, #tpu.memory_space<vmem>>, %arg6: memref<384x128xbf16, #tpu.memory_space<vmem>>, %arg7: memref<2x16x128xf32, #tpu.memory_space<vmem>>) attributes {dimension_semantics = [#tpu.dimension_semantics<parallel>], iteration_bounds = array<i64: 1>, scalar_prefetch = 0 : i64, scratch_operands = 0 : i64, tpu.core_type = #tpu.core_type<tc>, window_params = [{transform_indices = @transform_0, window_bounds = array<i64: 2, 16, 128>}, {transform_indices = @transform_1, window_bounds = array<i64: 2, 1, 128>}, {pipeline_mode = #tpu.pipeline_mode<synchronous>, transform_indices = @transform_2, window_bounds = array<i64: 8, 128>}, {pipeline_mode = #tpu.pipeline_mode<synchronous>, transform_indices = @transform_3, window_bounds = array<i64: 128, 128>}, {pipeline_mode = #tpu.pipeline_mode<synchronous>, transform_indices = @transform_4, window_bounds = array<i64: 384, 128>}, {pipeline_mode = #tpu.pipeline_mode<synchronous>, transform_indices = @transform_5, window_bounds = array<i64: 384, 128>}, {transform_indices = @transform_6, window_bounds = array<i64: 2, 16, 128>}]} {
    %c0 = arith.constant 0 : index
    %c0_0 = arith.constant 0 : index
    %c0_1 = arith.constant 0 : index
    %0 = vector.load %arg1[%c0, %c0_0, %c0_1] : memref<2x16x128xf32, #tpu.memory_space<vmem>>, vector<2x16x128xf32>
    %c0_2 = arith.constant 0 : index
    %c0_3 = arith.constant 0 : index
    %1 = vector.load %arg3[%c0_2, %c0_3] : memref<8x128xf32, #tpu.memory_space<vmem>>, vector<1x128xf32>
    %c1 = arith.constant 1 : index
    %c0_4 = arith.constant 0 : index
    %2 = vector.load %arg3[%c1, %c0_4] : memref<8x128xf32, #tpu.memory_space<vmem>>, vector<1x128xf32>
    %c2 = arith.constant 2 : index
    %c0_5 = arith.constant 0 : index
    %3 = vector.load %arg3[%c2, %c0_5] : memref<8x128xf32, #tpu.memory_space<vmem>>, vector<1x128xf32>
    %c3 = arith.constant 3 : index
    %c0_6 = arith.constant 0 : index
    %4 = vector.load %arg3[%c3, %c0_6] : memref<8x128xf32, #tpu.memory_space<vmem>>, vector<1x128xf32>
    %c4 = arith.constant 4 : index
    %c0_7 = arith.constant 0 : index
    %5 = vector.load %arg3[%c4, %c0_7] : memref<8x128xf32, #tpu.memory_space<vmem>>, vector<1x128xf32>
    %c5 = arith.constant 5 : index
    %c0_8 = arith.constant 0 : index
    %6 = vector.load %arg3[%c5, %c0_8] : memref<8x128xf32, #tpu.memory_space<vmem>>, vector<1x128xf32>
    %cst = arith.constant 5.000000e-01 : f32
    %7 = vector.broadcast %cst : f32 to vector<2x16x128xf32>
    %8 = arith.mulf %7, %0 : vector<2x16x128xf32>
    %9 = math.tanh %8 : vector<2x16x128xf32>
    %cst_9 = arith.constant 1.000000e+00 : f32
    %10 = vector.broadcast %cst_9 : f32 to vector<2x16x128xf32>
    %11 = arith.addf %9, %10 : vector<2x16x128xf32>
    %cst_10 = arith.constant 5.000000e-01 : f32
    %12 = vector.broadcast %cst_10 : f32 to vector<2x16x128xf32>
    %13 = arith.mulf %12, %11 : vector<2x16x128xf32>
    %14 = arith.mulf %0, %13 : vector<2x16x128xf32>
    %cst_11 = arith.constant dense<0.000000e+00> : vector<2x128xf32>
    %15 = vector.multi_reduction <add>, %14, %cst_11 [1] : vector<2x16x128xf32> to vector<2x128xf32>
    %cst_12 = arith.constant 1.600000e+01 : f32
    %16 = vector.broadcast %cst_12 : f32 to vector<2x128xf32>
    %17 = arith.divf %15, %16 : vector<2x128xf32>
    %18 = arith.mulf %14, %14 : vector<2x16x128xf32>
    %cst_13 = arith.constant dense<0.000000e+00> : vector<2x128xf32>
    %19 = vector.multi_reduction <add>, %18, %cst_13 [1] : vector<2x16x128xf32> to vector<2x128xf32>
    %cst_14 = arith.constant 1.600000e+01 : f32
    %20 = vector.broadcast %cst_14 : f32 to vector<2x128xf32>
    %21 = arith.divf %19, %20 : vector<2x128xf32>
    %22 = tpu.concatenate %17, %21 in 0 : vector<2x128xf32>, vector<2x128xf32> -> vector<4x128xf32>
    %c0_15 = arith.constant 0 : index
    %c0_16 = arith.constant 0 : index
    %23 = vector.load %arg4[%c0_15, %c0_16] : memref<128x128xf32, #tpu.memory_space<vmem>>, vector<128x128xf32>
    %cst_17 = arith.constant dense<0.000000e+00> : vector<4x128xf32>
    %24 = tpu.matmul %22, %23, %cst_17 {dimension_numbers = #tpu.dot_dimension_numbers<[1], [0], [0], [1], [0, 0, 1, 1], [], []>} : vector<4x128xf32>, vector<128x128xf32>, vector<4x128xf32> -> vector<4x128xf32>
    %25 = vector.extract_strided_slice %24 {offsets = [0, 0], sizes = [2, 128], strides = [1, 1]} : vector<4x128xf32> to vector<2x128xf32>
    %26 = vector.extract_strided_slice %24 {offsets = [2, 0], sizes = [2, 128], strides = [1, 1]} : vector<4x128xf32> to vector<2x128xf32>
    %27 = arith.mulf %25, %25 : vector<2x128xf32>
    %28 = arith.subf %26, %27 : vector<2x128xf32>
    %cst_18 = arith.constant 9.99999974E-6 : f32
    %29 = vector.broadcast %cst_18 : f32 to vector<2x128xf32>
    %30 = arith.addf %28, %29 : vector<2x128xf32>
    %31 = math.rsqrt %30 : vector<2x128xf32>
    %32 = vector.shape_cast %25 : vector<2x128xf32> to vector<2x1x128xf32>
    %33 = vector.broadcast %32 : vector<2x1x128xf32> to vector<2x16x128xf32>
    %34 = arith.subf %14, %33 : vector<2x16x128xf32>
    %35 = vector.shape_cast %31 : vector<2x128xf32> to vector<2x1x128xf32>
    %36 = vector.broadcast %35 : vector<2x1x128xf32> to vector<2x16x128xf32>
    %37 = arith.mulf %34, %36 : vector<2x16x128xf32>
    %38 = vector.shape_cast %1 : vector<1x128xf32> to vector<1x1x128xf32>
    %39 = vector.broadcast %38 : vector<1x1x128xf32> to vector<2x16x128xf32>
    %40 = arith.mulf %37, %39 : vector<2x16x128xf32>
    %41 = vector.shape_cast %2 : vector<1x128xf32> to vector<1x1x128xf32>
    %42 = vector.broadcast %41 : vector<1x1x128xf32> to vector<2x16x128xf32>
    %43 = arith.addf %40, %42 : vector<2x16x128xf32>
    %44 = vector.shape_cast %43 : vector<2x16x128xf32> to vector<32x128xf32>
    %45 = tpu.iota {dimensions = array<i32: 0>} : vector<32x128xi32>
    %c16_i32 = arith.constant 16 : i32
    %c0_i32 = arith.constant 0 : i32
    %46 = arith.cmpi eq, %c16_i32, %c0_i32 : i32
    %c1_i32 = arith.constant 1 : i32
    %47 = arith.select %46, %c1_i32, %c16_i32 : i32
    %48 = vector.broadcast %47 : i32 to vector<32x128xi32>
    %49 = arith.remsi %45, %48 : vector<32x128xi32>
    %c0_i32_19 = arith.constant 0 : i32
    %50 = vector.broadcast %c0_i32_19 : i32 to vector<32x128xi32>
    %51 = arith.cmpi ne, %49, %50 : vector<32x128xi32>
    %c0_i32_20 = arith.constant 0 : i32
    %52 = vector.broadcast %c0_i32_20 : i32 to vector<32x128xi32>
    %53 = arith.cmpi slt, %49, %52 : vector<32x128xi32>
    %c0_i32_21 = arith.constant 0 : i32
    %54 = arith.cmpi slt, %47, %c0_i32_21 : i32
    %55 = vector.broadcast %54 : i1 to vector<32x128xi1>
    %56 = vector.broadcast %55 : vector<32x128xi1> to vector<32x128xi1>
    %57 = arith.xori %53, %56 : vector<32x128xi1>
    %58 = arith.andi %57, %51 : vector<32x128xi1>
    %59 = vector.broadcast %47 : i32 to vector<32x128xi32>
    %60 = arith.addi %49, %59 : vector<32x128xi32>
    %61 = arith.select %58, %60, %49 : vector<32x128xi1>, vector<32x128xi32>
    %c1_i32_22 = arith.constant 1 : i32
    %62 = vector.broadcast %c1_i32_22 : i32 to vector<32x128xi32>
    %63 = arith.cmpi sge, %61, %62 : vector<32x128xi32>
    %c1_i32_23 = arith.constant 1 : i32
    %64 = tpu.dynamic_rotate %44 by %c1_i32_23 dim 0 : vector<32x128xf32>, i32 -> vector<32x128xf32>
    %cst_24 = arith.constant 0.000000e+00 : f32
    %65 = vector.broadcast %cst_24 : f32 to vector<32x128xf32>
    %66 = arith.select %63, %64, %65 : vector<32x128xi1>, vector<32x128xf32>
    %c14_i32 = arith.constant 14 : i32
    %67 = vector.broadcast %c14_i32 : i32 to vector<32x128xi32>
    %68 = arith.cmpi sle, %61, %67 : vector<32x128xi32>
    %c31_i32 = arith.constant 31 : i32
    %69 = tpu.dynamic_rotate %44 by %c31_i32 dim 0 : vector<32x128xf32>, i32 -> vector<32x128xf32>
    %cst_25 = arith.constant 0.000000e+00 : f32
    %70 = vector.broadcast %cst_25 : f32 to vector<32x128xf32>
    %71 = arith.select %68, %69, %70 : vector<32x128xi1>, vector<32x128xf32>
    %72 = tpu.concatenate %66, %44, %71 in 1 : vector<32x128xf32>, vector<32x128xf32>, vector<32x128xf32> -> vector<32x384xf32>
    %73 = arith.truncf %72 : vector<32x384xf32> to vector<32x384xbf16>
    %c0_26 = arith.constant 0 : index
    %c0_27 = arith.constant 0 : index
    %74 = vector.load %arg5[%c0_26, %c0_27] : memref<384x128xbf16, #tpu.memory_space<vmem>>, vector<384x128xbf16>
    %cst_28 = arith.constant dense<0.000000e+00> : vector<32x128xf32>
    %75 = tpu.matmul %73, %74, %cst_28 {dimension_numbers = #tpu.dot_dimension_numbers<[1], [0], [0], [1], [0, 0, 1, 1], [], []>} : vector<32x384xbf16>, vector<384x128xbf16>, vector<32x128xf32> -> vector<32x128xf32>
    %76 = vector.shape_cast %75 : vector<32x128xf32> to vector<2x16x128xf32>
    %77 = vector.shape_cast %3 : vector<1x128xf32> to vector<1x1x128xf32>
    %78 = vector.broadcast %77 : vector<1x1x128xf32> to vector<2x16x128xf32>
    %79 = arith.addf %76, %78 : vector<2x16x128xf32>
    %c0_29 = arith.constant 0 : index
    %c0_30 = arith.constant 0 : index
    %c0_31 = arith.constant 0 : index
    %80 = vector.load %arg2[%c0_29, %c0_30, %c0_31] : memref<2x1x128xf32, #tpu.memory_space<vmem>>, vector<2x1x128xf32>
    %81 = vector.broadcast %80 : vector<2x1x128xf32> to vector<2x16x128xf32>
    %82 = arith.addf %79, %81 : vector<2x16x128xf32>
    %cst_32 = arith.constant 5.000000e-01 : f32
    %83 = vector.broadcast %cst_32 : f32 to vector<2x16x128xf32>
    %84 = arith.mulf %83, %82 : vector<2x16x128xf32>
    %85 = math.tanh %84 : vector<2x16x128xf32>
    %cst_33 = arith.constant 1.000000e+00 : f32
    %86 = vector.broadcast %cst_33 : f32 to vector<2x16x128xf32>
    %87 = arith.addf %85, %86 : vector<2x16x128xf32>
    %cst_34 = arith.constant 5.000000e-01 : f32
    %88 = vector.broadcast %cst_34 : f32 to vector<2x16x128xf32>
    %89 = arith.mulf %88, %87 : vector<2x16x128xf32>
    %90 = arith.mulf %82, %89 : vector<2x16x128xf32>
    %cst_35 = arith.constant dense<0.000000e+00> : vector<2x128xf32>
    %91 = vector.multi_reduction <add>, %90, %cst_35 [1] : vector<2x16x128xf32> to vector<2x128xf32>
    %cst_36 = arith.constant 1.600000e+01 : f32
    %92 = vector.broadcast %cst_36 : f32 to vector<2x128xf32>
    %93 = arith.divf %91, %92 : vector<2x128xf32>
    %94 = arith.mulf %90, %90 : vector<2x16x128xf32>
    %cst_37 = arith.constant dense<0.000000e+00> : vector<2x128xf32>
    %95 = vector.multi_reduction <add>, %94, %cst_37 [1] : vector<2x16x128xf32> to vector<2x128xf32>
    %cst_38 = arith.constant 1.600000e+01 : f32
    %96 = vector.broadcast %cst_38 : f32 to vector<2x128xf32>
    %97 = arith.divf %95, %96 : vector<2x128xf32>
    %98 = tpu.concatenate %93, %97 in 0 : vector<2x128xf32>, vector<2x128xf32> -> vector<4x128xf32>
    %c0_39 = arith.constant 0 : index
    %c0_40 = arith.constant 0 : index
    %99 = vector.load %arg4[%c0_39, %c0_40] : memref<128x128xf32, #tpu.memory_space<vmem>>, vector<128x128xf32>
    %cst_41 = arith.constant dense<0.000000e+00> : vector<4x128xf32>
    %100 = tpu.matmul %98, %99, %cst_41 {dimension_numbers = #tpu.dot_dimension_numbers<[1], [0], [0], [1], [0, 0, 1, 1], [], []>} : vector<4x128xf32>, vector<128x128xf32>, vector<4x128xf32> -> vector<4x128xf32>
    %101 = vector.extract_strided_slice %100 {offsets = [0, 0], sizes = [2, 128], strides = [1, 1]} : vector<4x128xf32> to vector<2x128xf32>
    %102 = vector.extract_strided_slice %100 {offsets = [2, 0], sizes = [2, 128], strides = [1, 1]} : vector<4x128xf32> to vector<2x128xf32>
    %103 = arith.mulf %101, %101 : vector<2x128xf32>
    %104 = arith.subf %102, %103 : vector<2x128xf32>
    %cst_42 = arith.constant 9.99999974E-6 : f32
    %105 = vector.broadcast %cst_42 : f32 to vector<2x128xf32>
    %106 = arith.addf %104, %105 : vector<2x128xf32>
    %107 = math.rsqrt %106 : vector<2x128xf32>
    %108 = vector.shape_cast %101 : vector<2x128xf32> to vector<2x1x128xf32>
    %109 = vector.broadcast %108 : vector<2x1x128xf32> to vector<2x16x128xf32>
    %110 = arith.subf %90, %109 : vector<2x16x128xf32>
    %111 = vector.shape_cast %107 : vector<2x128xf32> to vector<2x1x128xf32>
    %112 = vector.broadcast %111 : vector<2x1x128xf32> to vector<2x16x128xf32>
    %113 = arith.mulf %110, %112 : vector<2x16x128xf32>
    %114 = vector.shape_cast %4 : vector<1x128xf32> to vector<1x1x128xf32>
    %115 = vector.broadcast %114 : vector<1x1x128xf32> to vector<2x16x128xf32>
    %116 = arith.mulf %113, %115 : vector<2x16x128xf32>
    %117 = vector.shape_cast %5 : vector<1x128xf32> to vector<1x1x128xf32>
    %118 = vector.broadcast %117 : vector<1x1x128xf32> to vector<2x16x128xf32>
    %119 = arith.addf %116, %118 : vector<2x16x128xf32>
    %120 = vector.shape_cast %119 : vector<2x16x128xf32> to vector<32x128xf32>
    %121 = tpu.iota {dimensions = array<i32: 0>} : vector<32x128xi32>
    %c16_i32_43 = arith.constant 16 : i32
    %c0_i32_44 = arith.constant 0 : i32
    %122 = arith.cmpi eq, %c16_i32_43, %c0_i32_44 : i32
    %c1_i32_45 = arith.constant 1 : i32
    %123 = arith.select %122, %c1_i32_45, %c16_i32_43 : i32
    %124 = vector.broadcast %123 : i32 to vector<32x128xi32>
    %125 = arith.remsi %121, %124 : vector<32x128xi32>
    %c0_i32_46 = arith.constant 0 : i32
    %126 = vector.broadcast %c0_i32_46 : i32 to vector<32x128xi32>
    %127 = arith.cmpi ne, %125, %126 : vector<32x128xi32>
    %c0_i32_47 = arith.constant 0 : i32
    %128 = vector.broadcast %c0_i32_47 : i32 to vector<32x128xi32>
    %129 = arith.cmpi slt, %125, %128 : vector<32x128xi32>
    %c0_i32_48 = arith.constant 0 : i32
    %130 = arith.cmpi slt, %123, %c0_i32_48 : i32
    %131 = vector.broadcast %130 : i1 to vector<32x128xi1>
    %132 = vector.broadcast %131 : vector<32x128xi1> to vector<32x128xi1>
    %133 = arith.xori %129, %132 : vector<32x128xi1>
    %134 = arith.andi %133, %127 : vector<32x128xi1>
    %135 = vector.broadcast %123 : i32 to vector<32x128xi32>
    %136 = arith.addi %125, %135 : vector<32x128xi32>
    %137 = arith.select %134, %136, %125 : vector<32x128xi1>, vector<32x128xi32>
    %c1_i32_49 = arith.constant 1 : i32
    %138 = vector.broadcast %c1_i32_49 : i32 to vector<32x128xi32>
    %139 = arith.cmpi sge, %137, %138 : vector<32x128xi32>
    %c1_i32_50 = arith.constant 1 : i32
    %140 = tpu.dynamic_rotate %120 by %c1_i32_50 dim 0 : vector<32x128xf32>, i32 -> vector<32x128xf32>
    %cst_51 = arith.constant 0.000000e+00 : f32
    %141 = vector.broadcast %cst_51 : f32 to vector<32x128xf32>
    %142 = arith.select %139, %140, %141 : vector<32x128xi1>, vector<32x128xf32>
    %c14_i32_52 = arith.constant 14 : i32
    %143 = vector.broadcast %c14_i32_52 : i32 to vector<32x128xi32>
    %144 = arith.cmpi sle, %137, %143 : vector<32x128xi32>
    %c31_i32_53 = arith.constant 31 : i32
    %145 = tpu.dynamic_rotate %120 by %c31_i32_53 dim 0 : vector<32x128xf32>, i32 -> vector<32x128xf32>
    %cst_54 = arith.constant 0.000000e+00 : f32
    %146 = vector.broadcast %cst_54 : f32 to vector<32x128xf32>
    %147 = arith.select %144, %145, %146 : vector<32x128xi1>, vector<32x128xf32>
    %148 = tpu.concatenate %142, %120, %147 in 1 : vector<32x128xf32>, vector<32x128xf32>, vector<32x128xf32> -> vector<32x384xf32>
    %149 = arith.truncf %148 : vector<32x384xf32> to vector<32x384xbf16>
    %c0_55 = arith.constant 0 : index
    %c0_56 = arith.constant 0 : index
    %150 = vector.load %arg6[%c0_55, %c0_56] : memref<384x128xbf16, #tpu.memory_space<vmem>>, vector<384x128xbf16>
    %cst_57 = arith.constant dense<0.000000e+00> : vector<32x128xf32>
    %151 = tpu.matmul %149, %150, %cst_57 {dimension_numbers = #tpu.dot_dimension_numbers<[1], [0], [0], [1], [0, 0, 1, 1], [], []>} : vector<32x384xbf16>, vector<384x128xbf16>, vector<32x128xf32> -> vector<32x128xf32>
    %152 = vector.shape_cast %151 : vector<32x128xf32> to vector<2x16x128xf32>
    %153 = vector.shape_cast %6 : vector<1x128xf32> to vector<1x1x128xf32>
    %154 = vector.broadcast %153 : vector<1x1x128xf32> to vector<2x16x128xf32>
    %155 = arith.addf %152, %154 : vector<2x16x128xf32>
    %156 = arith.addf %155, %0 : vector<2x16x128xf32>
    %c0_58 = arith.constant 0 : index
    %c0_59 = arith.constant 0 : index
    %c0_60 = arith.constant 0 : index
    %157 = vector.load %arg7[%c0_58, %c0_59, %c0_60] : memref<2x16x128xf32, #tpu.memory_space<vmem>>, vector<2x16x128xf32>
    tpu.vector_store %arg7[%c0_58, %c0_59, %c0_60], %156 {strides = array<i32>} : memref<2x16x128xf32, #tpu.memory_space<vmem>>, vector<2x16x128xf32>,
    return
  }
  func.func @transform_0(%arg0: i32) -> (i32, i32, i32) {
    %c0_i32 = arith.constant 0 : i32
    %c0_i32_0 = arith.constant 0 : i32
    %c0_i32_1 = arith.constant 0 : i32
    return %arg0, %c0_i32, %c0_i32_0 : i32, i32, i32
  }
  func.func @transform_1(%arg0: i32) -> (i32, i32, i32) {
    %c0_i32 = arith.constant 0 : i32
    %c0_i32_0 = arith.constant 0 : i32
    %c0_i32_1 = arith.constant 0 : i32
    return %arg0, %c0_i32, %c0_i32_0 : i32, i32, i32
  }
  func.func @transform_2(%arg0: i32) -> (i32, i32) {
    %c0_i32 = arith.constant 0 : i32
    %c0_i32_0 = arith.constant 0 : i32
    %c0_i32_1 = arith.constant 0 : i32
    return %c0_i32, %c0_i32_0 : i32, i32
  }
  func.func @transform_3(%arg0: i32) -> (i32, i32) {
    %c0_i32 = arith.constant 0 : i32
    %c0_i32_0 = arith.constant 0 : i32
    %c0_i32_1 = arith.constant 0 : i32
    return %c0_i32, %c0_i32_0 : i32, i32
  }
  func.func @transform_4(%arg0: i32) -> (i32, i32) {
    %c0_i32 = arith.constant 0 : i32
    %c0_i32_0 = arith.constant 0 : i32
    %c0_i32_1 = arith.constant 0 : i32
    return %c0_i32, %c0_i32_0 : i32, i32
  }
  func.func @transform_5(%arg0: i32) -> (i32, i32) {
    %c0_i32 = arith.constant 0 : i32
    %c0_i32_0 = arith.constant 0 : i32
    %c0_i32_1 = arith.constant 0 : i32
    return %c0_i32, %c0_i32_0 : i32, i32
  }
  func.func @transform_6(%arg0: i32) -> (i32, i32, i32) {
    %c0_i32 = arith.constant 0 : i32
    %c0_i32_0 = arith.constant 0 : i32
    %c0_i32_1 = arith.constant 0 : i32
    return %arg0, %c0_i32, %c0_i32_0 : i32, i32, i32
  }
}

</mosaic_0001>

<bundles_post_ra>
// kernel: residual_layer_forward.1
= control target key start
LH: loop header
LB: loop body
LE: loop exit
PB: predicated region body
PF: predicated region fallthrough
CT: control target
= control target key end

     0   :  { %v1280_v13 = vmov 16.0   ;;  %vm98_vm1 = vcmask 1041409   ;;  %vm103_vm2 = vcmask 1043459   ;;  %vm106_vm3 = vcmask 1041408   ;;  %s1782_s3 = inlined_call_operand.vmem [shape: f32[128,128], index: 3, kind: input, shape index: {}]   ;;  %s1783_s0 = inlined_call_operand.vmem [shape: f32[2,16,128], index: 0, kind: input, shape index: {}]   ;;  %s1784_s2 = inlined_call_operand.vmem [shape: f32[8,128], index: 2, kind: input, shape index: {}]   ;;  %s1785_s4 = inlined_call_operand.vmem [shape: bf16[384,128], index: 4, kind: input, shape index: {}]   ;;  %s1786_s1 = inlined_call_operand.vmem [shape: f32[2,1,128], index: 1, kind: input, shape index: {}]   ;;  %s1787_s5 = inlined_call_operand.vmem [shape: bf16[384,128], index: 5, kind: input, shape index: {}]   ;;  %s1788_s6 = inlined_call_operand.vmem [shape: f32[2,16,128], index: 6, kind: output, shape index: {}]  }
   0x1   :  { %v1320_v0 = vld [vmem:[%s1782_s3 + $0x78] sm:$0xff]  ;;  %v1325_v1 = vld [vmem:[%s1782_s3 + $0x70] sm:$0xff]  ;;  %v1331_v2 = vld [vmem:[%s1782_s3 + $0x68] sm:$0xff]  ;;  %1258 = vrcp.f32 %v1280_v13  ;;  %vm1281_vm11 = vmmov 1  }
   0x2   :  { %124 = vmatpush.msra.mxu0 %v1320_v0  ;;  %v1337_v3 = vld [vmem:[%s1782_s3 + $0x60] sm:$0xff]  ;;  %v1343_v4 = vld [vmem:[%s1782_s3 + $0x58] sm:$0xff]  ;;  %v1353_v6 = vld [vmem:[%s1783_s0 + $0x8] sm:$0xff] }
   0x3   :  { %v1348_v5 = vld [vmem:[%s1783_s0] sm:$0xff]  ;;  %v1358_v7 = vld [vmem:[%s1783_s0 + $0x10] sm:$0xff]  ;;  %v1363_v8 = vld [vmem:[%s1783_s0 + $0x18] sm:$0xff]  ;;  %v34_v10 = vmul.f32 0.5, %v1353_v6 }
   0x4   :  { %125 = vmatpush.msra.mxu0 %v1325_v1  ;;  %v33_v9 = vmul.f32 0.5, %v1348_v5  ;;  %v35_v11 = vmul.f32 0.5, %v1358_v7  ;;  %v36_v12 = vmul.f32 0.5, %v1363_v8  ;;  %v1373_v14 = vld [vmem:[%s1782_s3 + $0x50] sm:$0xff]  ;;  %v1379_v15 = vld [vmem:[%s1782_s3 + $0x48] sm:$0xff]  ;;  %v1385_v16 = vld [vmem:[%s1782_s3 + $0x40] sm:$0xff] }
   0x5   :  { %v1393_v19 = vld [vmem:[%s1782_s3 + $0x38] sm:$0xff]  ;;  %v1399_v23 = vld [vmem:[%s1782_s3 + $0x30] sm:$0xff]  ;;  %v1406_v29 = vld [vmem:[%s1782_s3 + $0x28] sm:$0xff] }
   0x6   :  { %126 = vmatpush.msra.mxu0 %v1331_v2  ;;  %1260 = vtanh.f32 %v33_v9  ;;  %v1415_v34 = vld [vmem:[%s1782_s3 + $0x20] sm:$0xff]  ;;  %v1429_v40 = vld [vmem:[%s1782_s3 + $0x18] sm:$0xff]  ;;  %v110_v45 = vld [vmem:[%s1782_s3 + $0x10] sm:$0xff] }
   0x7   :  { %1262 = vtanh.f32 %v34_v10  ;;  %v1387_v17 = vpop.eup %1258  ;;  %v109_v51 = vld [vmem:[%s1782_s3 + $0x8] sm:$0xff]  ;;  %v108_v56 = vld [vmem:[%s1782_s3] sm:$0xff] }
   0x8   :  { %127 = vmatpush.msra.mxu0 %v1337_v3  ;;  %1264 = vtanh.f32 %v35_v11  ;;  %v68_v28 = vmul.f32 16.0, %v1387_v17  ;;  %vm72_vm0 = vweird.f32 %v1387_v17 }
   0x9   :  { %1266 = vtanh.f32 %v36_v12 }
   0xa   :  { %128 = vmatpush.msra.mxu0 %v1343_v4  ;;  %v69_v38 = vsub.f32 1.0, %v68_v28 }
   0xc   :  { %129 = vmatpush.msra.mxu0 %v1373_v14  ;;  %v1261_v18 = vpop.eup %1260  ;;  %v70_v50 = vmul.f32 %v1387_v17, %v69_v38  ;;  %v1212_v38 = vld [vmem:[%s1785_s4 + $0x60] sm:$0xff] }
   0xd   :  { %v1263_v20 = vpop.eup %1262  ;;  %v41_v21 = vadd.f32 1.0, %v1261_v18 }
   0xe   :  { %130 = vmatpush.msra.mxu0 %v1379_v15  ;;  %v1265_v22 = vpop.eup %1264  ;;  %v42_v24 = vadd.f32 1.0, %v1263_v20  ;;  %v71_v61 = vadd.f32 %v1387_v17, %v70_v50  ;;  %v1218_v50 = vld [vmem:[%s1785_s4 + $0x90] sm:$0xff] }
   0xf   :  { %v1267_v25 = vpop.eup %1266  ;;  %v43_v26 = vadd.f32 1.0, %v1265_v22  ;;  %v45_v27 = vmul.f32 0.5, %v41_v21 }
  0x10   :  { %131 = vmatpush.msra.mxu0 %v1385_v16  ;;  %v44_v30 = vadd.f32 1.0, %v1267_v25  ;;  %v46_v31 = vmul.f32 0.5, %v42_v24  ;;  %v1460_v20 = vsel %vm72_vm0, %v1387_v17, %v71_v61 }
  0x11   :  { %v47_v32 = vmul.f32 0.5, %v43_v26  ;;  %v1410_v33 = vmul.f32 %v45_v27, %v1348_v5 }
  0x12   :  { %132 = vmatpush.msra.mxu0 %v1393_v19  ;;  %v48_v35 = vmul.f32 0.5, %v44_v30  ;;  %v1418_v36 = vmul.f32 %v46_v31, %v1353_v6 }
  0x13   :  { %v1422_v37 = vmul.f32 %v47_v32, %v1358_v7  ;;  %v76_v39 = vmul.f32 %v1410_v33, %v1410_v33 }
  0x14   :  { %133 = vmatpush.msra.mxu0 %v1399_v23  ;;  %v1432_v41 = vmul.f32 %v48_v35, %v1363_v8  ;;  %v53_v42 = vadd.f32 %v1418_v36, %v1410_v33  ;;  %v77_v43 = vmul.f32 %v1418_v36, %v1418_v36 }
  0x15   :  { %v78_v44 = vmul.f32 %v1422_v37, %v1422_v37 }
  0x16   :  { %134 = vmatpush.msra.mxu0 %v1406_v29  ;;  %v54_v46 = vrot.slane %v53_v42, 4  ;;  %v60_v47 = vadd.f32 %v1432_v41, %v1422_v37  ;;  %v79_v48 = vmul.f32 %v1432_v41, %v1432_v41  ;;  %v80_v49 = vadd.f32 %v77_v43, %v76_v39  ;;  %v1204_v39 = vld [vmem:[%s1785_s4 + $0x20] sm:$0xff]  ;;  %v1203_v43 = vld [vmem:[%s1785_s4 + $0x18] sm:$0xff] }
  0x18   :  { %135 = vmatpush.msra.mxu0 %v1415_v34  ;;  %v55_v52 = vadd.f32 %v54_v46, %v53_v42  ;;  %v61_v53 = vrot.slane %v60_v47, 4  ;;  %v81_v54 = vrot.slane %v80_v49, 4  ;;  %v87_v55 = vadd.f32 %v79_v48, %v78_v44  ;;  %v1211_v42 = vld [vmem:[%s1785_s4 + $0x58] sm:$0xff]  ;;  %v1210_v46 = vld [vmem:[%s1785_s4 + $0x50] sm:$0xff] }
  0x19   :  { %v1219_v44 = vld [vmem:[%s1785_s4 + $0x98] sm:$0xff] }
  0x1a   :  { %136 = vmatpush.msra.mxu0 %v1429_v40  ;;  %v56_v57 = vrot.slane %v55_v52, 2  ;;  %v62_v58 = vadd.f32 %v61_v53, %v60_v47  ;;  %v82_v59 = vadd.f32 %v81_v54, %v80_v49  ;;  %v88_v60 = vrot.slane %v87_v55, 4  ;;  %v1202_v49 = vld [vmem:[%s1785_s4 + $0x10] sm:$0xff]  ;;  %v1201_v54 = vld [vmem:[%s1785_s4 + $0x8] sm:$0xff] }
  0x1c   :  { %137 = vmatpush.msra.mxu0 %v110_v45  ;;  %v57_v62 = vadd.f32 %v56_v57, %v55_v52  ;;  %v63_v63 = vrot.slane %v62_v58, 2  ;;  %v83_v9 = vrot.slane %v82_v59, 2  ;;  %v89_v10 = vadd.f32 %v88_v60, %v87_v55  ;;  %v1217_v55 = vld [vmem:[%s1785_s4 + $0x88] sm:$0xff]  ;;  %v1200_v57 = vld [vmem:[%s1785_s4] sm:$0xff] }
  0x1e   :  { %138 = vmatpush.msra.mxu0 %v109_v51  ;;  %v58_v11 = vrot.slane %v57_v62, 1  ;;  %v64_v12 = vadd.f32 %v63_v63, %v62_v58  ;;  %v84_v13 = vadd.f32 %v83_v9, %v82_v59  ;;  %v90_v18 = vrot.slane %v89_v10, 2  ;;  %v1216_v58 = vld [vmem:[%s1785_s4 + $0x80] sm:$0xff] }
  0x20   :  { %139 = vmatpush.msra.mxu0 %v108_v56  ;;  %v59_v21 = vadd.f32 %v58_v11, %v57_v62  ;;  %v65_v22 = vrot.slane %v64_v12, 1  ;;  %v85_v24 = vrot.slane %v84_v13, 1  ;;  %v91_v25 = vadd.f32 %v90_v18, %v89_v10 }
  0x21   :  { %v194_v11 = vlaneseq }
  0x22   :  { %618 = vmatpush.msrb.mxu0 %v1320_v0  ;;  %v66_v26 = vadd.f32 %v65_v22, %v64_v12  ;;  %v74_v27 = vmul.f32 %v1460_v20, %v59_v21  ;;  %v86_v28 = vadd.f32 %v85_v24, %v84_v13  ;;  %v92_v30 = vrot.slane %v91_v25, 1 }
  0x23   :  { %v1553_v18 = vshrl.u32 %v194_v11, 7 }
  0x24   :  { %619 = vmatpush.msrb.mxu0 %v1325_v1  ;;  %v75_v31 = vmul.f32 %v1460_v20, %v66_v26  ;;  %v93_v0 = vadd.f32 %v92_v30, %v91_v25  ;;  %v94_v17 = vmul.f32 %v86_v28, %v1460_v20 }
  0x25   :  { %vm255_vm7 = vcmp.lt.s32.totalorder %v1553_v18, 1  ;;  %vm272_vm10 = vcmp.lt.s32.totalorder %v1553_v18, 7 }
  0x26   :  { %620 = vmatpush.msrb.mxu0 %v1331_v2  ;;  %v95_v32 = vmul.f32 %v93_v0, %v1460_v20  ;;  %v99_v1 = vsel %vm98_vm1, %v75_v31, %v74_v27  ;;  %v196_v27 = vadd.s32 8, %v1553_v18 }
  0x28   :  { %621 = vmatpush.msrb.mxu0 %v1337_v3  ;;  %v104_v35 = vsel %vm103_vm2, %v95_v32, %v94_v17  ;;  %v1215_v3 = vld [vmem:[%s1785_s4 + $0x78] sm:$0xff]  ;;  %v1250_v17 = vld [vmem:[%s1784_s2] ss:$0 sm:$0xff] }
  0x29   :  { %v107_v2 = vsel %vm106_vm3, %v99_v1, %v104_v35  ;;  %498 = vmatpush.bf16.msra.mxu2 %v1215_v3  ;;  %v210_v3 = vand.u32 15, %v196_v27  ;;  %v1253_v27 = vld [vmem:[%s1786_s1] ss:$0 sm:$0xff] }
  0x2a   :  { %622 = vmatpush.msrb.mxu0 %v1343_v4  ;;  %v1207_v4 = vld [vmem:[%s1785_s4 + $0x38] sm:$0xff] }
  0x2b   :  { %140 = vmatmul.f32.vlgmr.msra.gmra.mxu0 %v107_v2  ;;  %479 = vmatpush.bf16.msra.mxu1 %v1207_v4  ;;  %v203_v2 = vand.u32 15, %v1553_v18  ;;  %vm1568_vm9 = vcmp.le.s32.totalorder %v210_v3, 14 }
  0x2c   :  { %623 = vmatpush.msrb.mxu0 %v1373_v14  ;;  %v1223_v14 = vld [vmem:[%s1785_s4 + $0xb8] sm:$0xff]  ;;  %vm1589_vm13 = vmpackc.low %vm1568_vm9, %vm1281_vm11 }
  0x2d   :  { %517 = vmatpush.bf16.msra.mxu3 %v1223_v14  ;;  %vm247_vm8 = vcmp.ge.s32.totalorder %v203_v2, 1 }
  0x2e   :  { %624 = vmatpush.msrb.mxu0 %v1379_v15  ;;  %v1214_v15 = vld [vmem:[%s1785_s4 + $0x70] sm:$0xff]  ;;  %vm1578_vm12 = vmpackc.low %vm1281_vm11, %vm247_vm8 }
  0x2f   :  { %499 = vmatpush.bf16.msra.mxu2 %v1214_v15 }
  0x30   :  { %625 = vmatpush.msrb.mxu0 %v1385_v16  ;;  %v1206_v16 = vld [vmem:[%s1785_s4 + $0x30] sm:$0xff] }
  0x31   :  { %480 = vmatpush.bf16.msra.mxu1 %v1206_v16 }
  0x32   :  { %626 = vmatpush.msrb.mxu0 %v1393_v19  ;;  %v1222_v19 = vld [vmem:[%s1785_s4 + $0xb0] sm:$0xff] }
  0x33   :  { %518 = vmatpush.bf16.msra.mxu3 %v1222_v19 }
  0x34   :  { %627 = vmatpush.msrb.mxu0 %v1399_v23  ;;  %v1213_v23 = vld [vmem:[%s1785_s4 + $0x68] sm:$0xff] }
  0x35   :  { %500 = vmatpush.bf16.msra.mxu2 %v1213_v23 }
  0x36   :  { %628 = vmatpush.msrb.mxu0 %v1406_v29  ;;  %v1205_v29 = vld [vmem:[%s1785_s4 + $0x28] sm:$0xff] }
  0x37   :  { %481 = vmatpush.bf16.msra.mxu1 %v1205_v29 }
  0x38   :  { %629 = vmatpush.msrb.mxu0 %v1415_v34  ;;  %v1221_v34 = vld [vmem:[%s1785_s4 + $0xa8] sm:$0xff] }
  0x39   :  { %519 = vmatpush.bf16.msra.mxu3 %v1221_v34  ;;  %501 = vmatpush.bf16.msra.mxu2 %v1212_v38 }
  0x3a   :  { %630 = vmatpush.msrb.mxu0 %v1429_v40  ;;  %v1220_v40 = vld [vmem:[%s1785_s4 + $0xa0] sm:$0xff] }
  0x3b   :  { %482 = vmatpush.bf16.msra.mxu1 %v1204_v39 }
  0x3c   :  { %631 = vmatpush.msrb.mxu0 %v110_v45 }
  0x3d   :  { %520 = vmatpush.bf16.msra.mxu3 %v1220_v40  ;;  %502 = vmatpush.bf16.msra.mxu2 %v1211_v42 }
  0x3e   :  { %632 = vmatpush.msrb.mxu0 %v109_v51  ;;  %v1209_v51 = vld [vmem:[%s1785_s4 + $0x48] sm:$0xff] }
  0x3f   :  { %483 = vmatpush.bf16.msra.mxu1 %v1203_v43 }
  0x40   :  { %633 = vmatpush.msrb.mxu0 %v108_v56  ;;  %v1208_v56 = vld [vmem:[%s1785_s4 + $0x40] sm:$0xff] }
  0x41   :  { %521 = vmatpush.bf16.msra.mxu3 %v1219_v44  ;;  %503 = vmatpush.bf16.msra.mxu2 %v1210_v46 }
  0x43   :  { %484 = vmatpush.bf16.msra.mxu1 %v1202_v49 }
  0x45   :  { %522 = vmatpush.bf16.msra.mxu3 %v1218_v50  ;;  %504 = vmatpush.bf16.msra.mxu2 %v1209_v51 }
  0x47   :  { %485 = vmatpush.bf16.msra.mxu1 %v1201_v54  ;;  %v198_v54 = vadd.s32 24, %v1553_v18 }
  0x49   :  { %523 = vmatpush.bf16.msra.mxu3 %v1217_v55  ;;  %505 = vmatpush.bf16.msra.mxu2 %v1208_v56 }
  0x4b   :  { %486 = vmatpush.bf16.msra.mxu1 %v1200_v57  ;;  %v224_v57 = vand.u32 15, %v198_v54 }
  0x4d   :  { %524 = vmatpush.bf16.msra.mxu3 %v1216_v58  ;;  %vm267_vm15 = vcmp.le.s32.totalorder %v224_v57, 14 }
  0xa8   :  { %v141_v45 = vpop.f32.mrf.mxu0 }
  0xa9   :  { %v144_v47 = vmul.f32 %v141_v45, %v141_v45  ;;  %v161_v12 = vrot.slane %v141_v45, 1  ;;  %v162_v13 = vperm.slane %v141_v45, 0 }
  0xab   :  { %v146_v48 = vrot.slane %v144_v47, 6  ;;  %v163_v21 = vperm.slane %v161_v12, 0  ;;  %v166_v22 = vsub.f32 %v1410_v33, %v162_v13  ;;  %v167_v24 = vsub.f32 %v1418_v36, %v162_v13  ;;  %v1251_v36 = vld [vmem:[%s1784_s2 + $0x1] ss:$0 sm:$0xff] }
  0xad   :  { %v148_v52 = vsub.f32 %v141_v45, %v146_v48  ;;  %v168_v28 = vsub.f32 %v1422_v37, %v163_v21  ;;  %v169_v30 = vsub.f32 %v1432_v41, %v163_v21 }
  0xaf   :  { %v149_v53 = vadd.f32 1e-05, %v148_v52 }
  0xb1   :  { %1268 = vrsqrt.f32 %v149_v53  ;;  %vm156_vm5 = vweird.f32 %v149_v53 }
  0xb7   :  { %v1269_v59 = vpop.eup %1268 }
  0xb8   :  { %v151_v60 = vmul.f32 %v1269_v59, %v149_v53  ;;  %vm157_vm4 = vweird.f32 %v1269_v59  ;;  %v197_v53 = vadd.s32 16, %v1553_v18 }
  0xb9   :  { %vm158_vm6 = vmor %vm156_vm5, %vm157_vm4 }
  0xba   :  { %v152_v61 = vmul.f32 %v1269_v59, %v151_v60  ;;  %v217_v55 = vand.u32 15, %v197_v53  ;;  %vm1613_vm4 = vmpackc.low %vm267_vm15, %vm1281_vm11 }
  0xbc   :  { %v153_v62 = vmul.f32 0.5, %v152_v61  ;;  %vm249_vm14 = vcmp.ge.s32.totalorder %v217_v55, 1 }
  0xbd   :  { %vm1608_vm0 = vmpackc.low %vm1281_vm11, %vm249_vm14 }
  0xbe   :  { %v154_v63 = vsub.f32 1.5, %v153_v62 }
  0xc0   :  { %v155_v9 = vmul.f32 %v1269_v59, %v154_v63 }
  0xc2   :  { %v159_v10 = vsel %vm158_vm6, %v1269_v59, %v155_v9 }
  0xc3   :  { %171 = vst [vmem:[#allocation1] sm:$0xff] %v159_v10 }
  0xca   :  { %v173_v25 = vld [vmem:[#allocation1 + $0x2] ss:$9 sm:$0xff] }
  0xcb   :  { %v175_v26 = vld [vmem:[#allocation1 + $0x3] ss:$9 sm:$0xff]  ;;  %v176_v31 = vperm.slane %v173_v25, 0 }
  0xcc   :  { %v177_v0 = vperm.slane %v175_v26, 0 }
  0xcd   :  { %v180_v32 = vmul.f32 %v176_v31, %v166_v22  ;;  %v181_v1 = vmul.f32 %v176_v31, %v167_v24  ;;  %v1252_v24 = vld [vmem:[%s1784_s2 + $0x2] ss:$0 sm:$0xff] }
  0xce   :  { %v182_v35 = vmul.f32 %v177_v0, %v168_v28  ;;  %v183_v33 = vmul.f32 %v177_v0, %v169_v30 }
  0xcf   :  { %v185_v41 = vmul.f32 %v1250_v17, %v180_v32  ;;  %v186_v14 = vmul.f32 %v1250_v17, %v181_v1 }
  0xd0   :  { %v187_v37 = vmul.f32 %v1250_v17, %v182_v35  ;;  %v188_v4 = vmul.f32 %v1250_v17, %v183_v33 }
  0xd1   :  { %v190_v15 = vadd.f32 %v1251_v36, %v185_v41  ;;  %v191_v16 = vadd.f32 %v1251_v36, %v186_v14 }
  0xd2   :  { %v193_v19 = vadd.f32 %v1251_v36, %v188_v4  ;;  %v192_v23 = vadd.f32 %v1251_v36, %v187_v37 }
  0xd3   :  { %v282_v34 = vpack.c.bf16 %v191_v16, %v190_v15  ;;  %v251_v38 = vrot.slane %v190_v15, 7  ;;  %v252_v39 = vrot.slane %v191_v16, 7  ;;  %v268_v42 = vrot.slane %v190_v15, 1 }
  0xd4   :  { %v254_v40 = vrot.slane %v193_v19, 7  ;;  %v269_v43 = vrot.slane %v191_v16, 1  ;;  %v270_v44 = vrot.slane %v192_v23, 1  ;;  %v253_v56 = vrot.slane %v192_v23, 7  ;;  %v1254_v16 = vld [vmem:[%s1786_s1 + $0x1] ss:$0 sm:$0xff] }
  0xd5   :  { %506 = vmatmul.bf16.vlgmr.msra.gmra.mxu2 %v282_v34  ;;  %v258_v45 = vsel %vm255_vm7, %v251_v38, %v252_v39  ;;  %v271_v58 = vrot.slane %v193_v19, 1  ;;  %v285_v59 = vpack.c.bf16 %v193_v19, %v192_v23 }
  0xd6   :  { %v259_v46 = vsel %vm255_vm7, %v254_v40, %v251_v38  ;;  %v274_v49 = vsel %vm272_vm10, %v269_v43, %v270_v44  ;;  %v275_v50 = vsel %vm272_vm10, %v268_v42, %v269_v43  ;;  %v256_v60 = vsel %vm255_vm7, %v253_v56, %v254_v40 }
  0xd7   :  { %v1081_v48 = vpack.c.bf16 %v258_v45, %v259_v46  ;;  %v1087_v52 = vpack.c.bf16 %v274_v49, %v275_v50  ;;  %v257_v61 = vsel %vm255_vm7, %v252_v39, %v253_v56  ;;  %v273_v62 = vsel %vm272_vm10, %v270_v44, %v271_v58 }
  0xd8   :  { %v276_v63 = vsel %vm272_vm10, %v271_v58, %v268_v42  ;;  %v1084_v10 = vpack.c.bf16 %v256_v60, %v257_v61 }
  0xd9   :  { %1082 = vmatmul.msk.bf16.vlgmr.msra.gmra.mxu1 %vm1578_vm12, %v1081_v48  ;;  %1088 = vmatmul.msk.bf16.vlgmr.msra.gmra.mxu3 %vm1589_vm13, %v1087_v52  ;;  %v1090_v12 = vpack.c.bf16 %v276_v63, %v273_v62 }
  0xe5   :  { %511 = vmatmul.bf16.gmra.mxu2 %v285_v59 }
  0xe9   :  { %1085 = vmatmul.msk.bf16.gmra.mxu1 %vm1608_vm0, %v1084_v10  ;;  %1091 = vmatmul.msk.bf16.gmra.mxu3 %vm1613_vm4, %v1090_v12 }
 0x156   :  { %v488_v13 = vpop.f32.mrf.mxu1 }
 0x158   :  { %v507_v21 = vpop.f32.mrf.mxu2 }
 0x159   :  { %v508_v22 = vadd.f32 %v507_v21, %v488_v13 }
 0x15c   :  { %v526_v25 = vpop.f32.mrf.mxu3 }
 0x15d   :  { %v527_v26 = vadd.f32 %v526_v25, %v508_v22 }
 0x15e   :  { %v490_v28 = vpop.f32.mrf.mxu1 }
 0x15f   :  { %v537_v30 = vadd.f32 %v1252_v24, %v527_v26 }
 0x160   :  { %v509_v31 = vpop.f32.mrf.mxu2 }
 0x161   :  { %v549_v0 = vadd.f32 %v1253_v27, %v537_v30  ;;  %v510_v17 = vadd.f32 %v509_v31, %v490_v28 }
 0x163   :  { %v553_v32 = vmul.f32 0.5, %v549_v0 }
 0x164   :  { %v528_v1 = vpop.f32.mrf.mxu3 }
 0x165   :  { %v529_v35 = vadd.f32 %v528_v1, %v510_v17  ;;  %1270 = vtanh.f32 %v553_v32 }
 0x166   :  { %v493_v33 = vpop.f32.mrf.mxu1 }
 0x167   :  { %v538_v36 = vadd.f32 %v1252_v24, %v529_v35 }
 0x168   :  { %v512_v2 = vpop.f32.mrf.mxu2 }
 0x169   :  { %v550_v3 = vadd.f32 %v1253_v27, %v538_v36  ;;  %v513_v37 = vadd.f32 %v512_v2, %v493_v33 }
 0x16b   :  { %v554_v4 = vmul.f32 0.5, %v550_v3  ;;  %v1271_v14 = vpop.eup %1270 }
 0x16c   :  { %v531_v41 = vpop.f32.mrf.mxu3  ;;  %v561_v23 = vadd.f32 1.0, %v1271_v14 }
 0x16d   :  { %1272 = vtanh.f32 %v554_v4  ;;  %v532_v15 = vadd.f32 %v531_v41, %v513_v37 }
 0x16e   :  { %v495_v29 = vpop.f32.mrf.mxu1  ;;  %v565_v43 = vmul.f32 0.5, %v561_v23 }
 0x16f   :  { %v539_v19 = vadd.f32 %v1252_v24, %v532_v15 }
 0x170   :  { %v514_v34 = vpop.f32.mrf.mxu2  ;;  %v1630_v50 = vmul.f32 %v565_v43, %v549_v0 }
 0x171   :  { %v551_v38 = vadd.f32 %v1254_v16, %v539_v19  ;;  %v515_v39 = vadd.f32 %v514_v34, %v495_v29 }
 0x172   :  { %v589_v57 = vmul.f32 %v1630_v50, %v1630_v50 }
 0x173   :  { %v1273_v40 = vpop.eup %1272  ;;  %v555_v42 = vmul.f32 0.5, %v551_v38 }
 0x174   :  { %v562_v44 = vadd.f32 1.0, %v1273_v40  ;;  %v533_v45 = vpop.f32.mrf.mxu3 }
 0x175   :  { %1274 = vtanh.f32 %v555_v42  ;;  %v534_v46 = vadd.f32 %v533_v45, %v515_v39 }
 0x176   :  { %v566_v48 = vmul.f32 0.5, %v562_v44 }
 0x177   :  { %v540_v49 = vadd.f32 %v1252_v24, %v534_v46  ;;  %v1239_v46 = vld [vmem:[%s1787_s5 + $0x78] sm:$0xff] }
 0x178   :  { %v1632_v52 = vmul.f32 %v566_v48, %v550_v3  ;;  %929 = vmatpush.bf16.msrb.mxu2 %v1239_v46  ;;  %v1247_v48 = vld [vmem:[%s1787_s5 + $0xb8] sm:$0xff] }
 0x179   :  { %v552_v53 = vadd.f32 %v1254_v16, %v540_v49  ;;  %v1238_v49 = vld [vmem:[%s1787_s5 + $0x70] sm:$0xff]  ;;  %948 = vmatpush.bf16.msrb.mxu3 %v1247_v48 }
 0x17a   :  { %v590_v54 = vmul.f32 %v1632_v52, %v1632_v52  ;;  %v573_v58 = vadd.f32 %v1632_v52, %v1630_v50 }
 0x17b   :  { %v1275_v55 = vpop.eup %1274  ;;  %v556_v56 = vmul.f32 0.5, %v552_v53 }
 0x17c   :  { %v593_v59 = vadd.f32 %v590_v54, %v589_v57  ;;  %v563_v60 = vadd.f32 1.0, %v1275_v55  ;;  %v574_v61 = vrot.slane %v573_v58, 4  ;;  %930 = vmatpush.bf16.msrb.mxu2 %v1238_v49  ;;  %v1230_v54 = vld [vmem:[%s1787_s5 + $0x30] sm:$0xff]  ;;  %v1237_v55 = vld [vmem:[%s1787_s5 + $0x68] sm:$0xff] }
 0x17d   :  { %1276 = vtanh.f32 %v556_v56  ;;  %v1245_v56 = vld [vmem:[%s1787_s5 + $0xa8] sm:$0xff] }
 0x17e   :  { %v594_v62 = vrot.slane %v593_v59, 4  ;;  %v567_v63 = vmul.f32 0.5, %v563_v60  ;;  %v575_v13 = vadd.f32 %v574_v61, %v573_v58  ;;  %v1229_v57 = vld [vmem:[%s1787_s5 + $0x28] sm:$0xff]  ;;  %v1236_v58 = vld [vmem:[%s1787_s5 + $0x60] sm:$0xff]  ;;  %v1235_v61 = vld [vmem:[%s1787_s5 + $0x58] sm:$0xff] }
 0x17f   :  { %v1228_v60 = vld [vmem:[%s1787_s5 + $0x20] sm:$0xff] }
 0x180   :  { %v1640_v21 = vmul.f32 %v567_v63, %v551_v38  ;;  %v595_v24 = vadd.f32 %v594_v62, %v593_v59  ;;  %v576_v26 = vrot.slane %v575_v13, 2  ;;  %931 = vmatpush.bf16.msrb.mxu2 %v1237_v55  ;;  %v1244_v59 = vld [vmem:[%s1787_s5 + $0xa0] sm:$0xff] }
 0x182   :  { %v591_v27 = vmul.f32 %v1640_v21, %v1640_v21  ;;  %v596_v31 = vrot.slane %v595_v24, 2  ;;  %v577_v35 = vadd.f32 %v576_v26, %v575_v13  ;;  %v1234_v13 = vld [vmem:[%s1787_s5 + $0x50] sm:$0xff] }
 0x183   :  { %v1277_v10 = vpop.eup %1276  ;;  %v1242_v26 = vld [vmem:[%s1787_s5 + $0x90] sm:$0xff] }
 0x184   :  { %v564_v12 = vadd.f32 1.0, %v1277_v10  ;;  %v597_v33 = vadd.f32 %v596_v31, %v595_v24  ;;  %v578_v3 = vrot.slane %v577_v35, 1  ;;  %932 = vmatpush.bf16.msrb.mxu2 %v1236_v58  ;;  %v1243_v10 = vld [vmem:[%s1787_s5 + $0x98] sm:$0xff]  ;;  %v1241_v31 = vld [vmem:[%s1787_s5 + $0x88] sm:$0xff] }
 0x186   :  { %v568_v22 = vmul.f32 0.5, %v564_v12  ;;  %v598_v4 = vrot.slane %v597_v33, 1  ;;  %v579_v16 = vadd.f32 %v578_v3, %v577_v35  ;;  %v1227_v12 = vld [vmem:[%s1787_s5 + $0x18] sm:$0xff] }
 0x188   :  { %v1642_v25 = vmul.f32 %v568_v22, %v552_v53  ;;  %v599_v23 = vadd.f32 %v598_v4, %v597_v33  ;;  %v587_v39 = vmul.f32 %v579_v16, %v1460_v20  ;;  %v1246_v53 = vld [vmem:[%s1787_s5 + $0xb0] sm:$0xff]  ;;  %933 = vmatpush.bf16.msrb.mxu2 %v1235_v61 }
 0x189   :  { %949 = vmatpush.bf16.msrb.mxu3 %v1246_v53 }
 0x18a   :  { %v580_v28 = vadd.f32 %v1642_v25, %v1640_v21  ;;  %v592_v30 = vmul.f32 %v1642_v25, %v1642_v25  ;;  %v607_v40 = vmul.f32 %v599_v23, %v1460_v20 }
 0x18c   :  { %v581_v0 = vrot.slane %v580_v28, 4  ;;  %v600_v17 = vadd.f32 %v592_v30, %v591_v27  ;;  %934 = vmatpush.bf16.msrb.mxu2 %v1234_v13  ;;  %v1226_v27 = vld [vmem:[%s1787_s5 + $0x10] sm:$0xff] }
 0x18d   :  { %950 = vmatpush.bf16.msrb.mxu3 %v1245_v56 }
 0x18e   :  { %v582_v32 = vadd.f32 %v581_v0, %v580_v28  ;;  %v601_v1 = vrot.slane %v600_v17, 4  ;;  %v1233_v28 = vld [vmem:[%s1787_s5 + $0x48] sm:$0xff] }
 0x18f   :  { %v1225_v0 = vld [vmem:[%s1787_s5 + $0x8] sm:$0xff] }
 0x190   :  { %v583_v36 = vrot.slane %v582_v32, 2  ;;  %v602_v2 = vadd.f32 %v601_v1, %v600_v17  ;;  %935 = vmatpush.bf16.msrb.mxu2 %v1233_v28  ;;  %v1232_v17 = vld [vmem:[%s1787_s5 + $0x40] sm:$0xff] }
 0x191   :  { %951 = vmatpush.bf16.msrb.mxu3 %v1244_v59  ;;  %v1224_v1 = vld [vmem:[%s1787_s5] sm:$0xff] }
 0x192   :  { %v584_v37 = vadd.f32 %v583_v36, %v582_v32  ;;  %v603_v41 = vrot.slane %v602_v2, 2  ;;  %v1240_v32 = vld [vmem:[%s1787_s5 + $0x80] sm:$0xff] }
 0x194   :  { %v585_v14 = vrot.slane %v584_v37, 1  ;;  %v604_v15 = vadd.f32 %v603_v41, %v602_v2  ;;  %936 = vmatpush.bf16.msrb.mxu2 %v1232_v17 }
 0x195   :  { %952 = vmatpush.bf16.msrb.mxu3 %v1243_v10 }
 0x196   :  { %v586_v19 = vadd.f32 %v585_v14, %v584_v37  ;;  %v605_v29 = vrot.slane %v604_v15, 1 }
 0x198   :  { %v588_v34 = vmul.f32 %v586_v19, %v1460_v20  ;;  %v606_v38 = vadd.f32 %v605_v29, %v604_v15 }
 0x199   :  { %953 = vmatpush.bf16.msrb.mxu3 %v1242_v26 }
 0x19a   :  { %v608_v42 = vmul.f32 %v606_v38, %v1460_v20  ;;  %v611_v43 = vsel %vm98_vm1, %v588_v34, %v587_v39  ;;  %v1231_v20 = vld [vmem:[%s1787_s5 + $0x38] sm:$0xff] }
 0x19b   :  { %910 = vmatpush.bf16.msrb.mxu1 %v1231_v20 }
 0x19c   :  { %v615_v44 = vsel %vm103_vm2, %v608_v42, %v607_v40  ;;  %v1255_v42 = vld [vmem:[%s1784_s2 + $0x3] ss:$0 sm:$0xff] }
 0x19d   :  { %v617_v45 = vsel %vm106_vm3, %v611_v43, %v615_v44  ;;  %954 = vmatpush.bf16.msrb.mxu3 %v1241_v31 }
 0x19e   :  { %634 = vmatmul.f32.vlgmr.msrb.gmra.mxu0 %v617_v45 }
 0x19f   :  { %911 = vmatpush.bf16.msrb.mxu1 %v1230_v54 }
 0x1a1   :  { %955 = vmatpush.bf16.msrb.mxu3 %v1240_v32 }
 0x1a3   :  { %912 = vmatpush.bf16.msrb.mxu1 %v1229_v57 }
 0x1a7   :  { %913 = vmatpush.bf16.msrb.mxu1 %v1228_v60 }
 0x1ab   :  { %914 = vmatpush.bf16.msrb.mxu1 %v1227_v12 }
 0x1af   :  { %915 = vmatpush.bf16.msrb.mxu1 %v1226_v27 }
 0x1b3   :  { %916 = vmatpush.bf16.msrb.mxu1 %v1225_v0 }
 0x1b7   :  { %917 = vmatpush.bf16.msrb.mxu1 %v1224_v1 }
 0x21b   :  { %v635_v62 = vpop.f32.mrf.mxu0 }
 0x21c   :  { %v638_v63 = vmul.f32 %v635_v62, %v635_v62  ;;  %v655_v41 = vrot.slane %v635_v62, 1  ;;  %v656_v14 = vperm.slane %v635_v62, 0 }
 0x21e   :  { %v640_v22 = vrot.slane %v638_v63, 6  ;;  %v657_v15 = vperm.slane %v655_v41, 0  ;;  %v660_v16 = vsub.f32 %v1630_v50, %v656_v14  ;;  %v661_v19 = vsub.f32 %v1632_v52, %v656_v14  ;;  %v1256_v50 = vld [vmem:[%s1784_s2 + $0x4] ss:$0 sm:$0xff] }
 0x220   :  { %v642_v24 = vsub.f32 %v635_v62, %v640_v22  ;;  %v662_v34 = vsub.f32 %v1640_v21, %v657_v15  ;;  %v663_v38 = vsub.f32 %v1642_v25, %v657_v15 }
 0x222   :  { %v643_v30 = vadd.f32 1e-05, %v642_v24 }
 0x224   :  { %1278 = vrsqrt.f32 %v643_v30  ;;  %vm650_vm2 = vweird.f32 %v643_v30 }
 0x22a   :  { %v1279_v35 = vpop.eup %1278 }
 0x22b   :  { %v645_v33 = vmul.f32 %v1279_v35, %v643_v30  ;;  %vm651_vm1 = vweird.f32 %v1279_v35 }
 0x22c   :  { %vm652_vm3 = vmor %vm650_vm2, %vm651_vm1 }
 0x22d   :  { %v646_v36 = vmul.f32 %v1279_v35, %v645_v33 }
 0x22f   :  { %v647_v2 = vmul.f32 0.5, %v646_v36 }
 0x231   :  { %v648_v3 = vsub.f32 1.5, %v647_v2 }
 0x233   :  { %v649_v37 = vmul.f32 %v1279_v35, %v648_v3 }
 0x235   :  { %v653_v4 = vsel %vm652_vm3, %v1279_v35, %v649_v37  ;;  %v1257_v35 = vld [vmem:[%s1784_s2 + $0x5] ss:$0 sm:$0xff] }
 0x236   :  { %665 = vst [vmem:[#allocation1] sm:$0xff] %v653_v4 }
 0x23d   :  { %v667_v23 = vld [vmem:[#allocation1 + $0x2] ss:$9 sm:$0xff] }
 0x23e   :  { %v669_v29 = vld [vmem:[#allocation1 + $0x3] ss:$9 sm:$0xff]  ;;  %v670_v39 = vperm.slane %v667_v23, 0 }
 0x23f   :  { %v671_v40 = vperm.slane %v669_v29, 0 }
 0x240   :  { %v674_v43 = vmul.f32 %v670_v39, %v660_v16  ;;  %v675_v44 = vmul.f32 %v670_v39, %v661_v19 }
 0x241   :  { %v676_v45 = vmul.f32 %v671_v40, %v662_v34  ;;  %v677_v46 = vmul.f32 %v671_v40, %v663_v38 }
 0x242   :  { %v679_v52 = vmul.f32 %v1255_v42, %v674_v43  ;;  %v680_v48 = vmul.f32 %v1255_v42, %v675_v44 }
 0x243   :  { %v681_v20 = vmul.f32 %v1255_v42, %v676_v45  ;;  %v682_v21 = vmul.f32 %v1255_v42, %v677_v46 }
 0x244   :  { %v684_v53 = vadd.f32 %v1256_v50, %v679_v52  ;;  %v685_v54 = vadd.f32 %v1256_v50, %v680_v48 }
 0x245   :  { %v686_v49 = vadd.f32 %v1256_v50, %v681_v20  ;;  %v687_v25 = vadd.f32 %v1256_v50, %v682_v21 }
 0x246   :  { %v713_v55 = vpack.c.bf16 %v685_v54, %v684_v53  ;;  %v688_v56 = vrot.slane %v684_v53, 7  ;;  %v689_v57 = vrot.slane %v685_v54, 7  ;;  %v700_v59 = vrot.slane %v684_v53, 1 }
 0x247   :  { %v691_v58 = vrot.slane %v687_v25, 7  ;;  %v701_v60 = vrot.slane %v685_v54, 1  ;;  %v702_v61 = vrot.slane %v686_v49, 1  ;;  %v690_v24 = vrot.slane %v686_v49, 7 }
 0x248   :  { %937 = vmatmul.bf16.vlgmr.msrb.gmra.mxu2 %v713_v55  ;;  %v694_v62 = vsel %vm255_vm7, %v688_v56, %v689_v57  ;;  %v703_v26 = vrot.slane %v687_v25, 1  ;;  %v716_v27 = vpack.c.bf16 %v687_v25, %v686_v49 }
 0x249   :  { %v695_v63 = vsel %vm255_vm7, %v691_v58, %v688_v56  ;;  %v705_v12 = vsel %vm272_vm10, %v701_v60, %v702_v61  ;;  %v706_v13 = vsel %vm272_vm10, %v700_v59, %v701_v60  ;;  %v692_v28 = vsel %vm255_vm7, %v690_v24, %v691_v58 }
 0x24a   :  { %v1189_v10 = vpack.c.bf16 %v694_v62, %v695_v63  ;;  %v1195_v22 = vpack.c.bf16 %v705_v12, %v706_v13  ;;  %v693_v30 = vsel %vm255_vm7, %v689_v57, %v690_v24  ;;  %v704_v31 = vsel %vm272_vm10, %v702_v61, %v703_v26 }
 0x24b   :  { %v707_v0 = vsel %vm272_vm10, %v703_v26, %v700_v59  ;;  %v1192_v47 = vpack.c.bf16 %v692_v28, %v693_v30 }
 0x24c   :  { %1190 = vmatmul.msk.bf16.vlgmr.msrb.gmra.mxu1 %vm1578_vm12, %v1189_v10  ;;  %1196 = vmatmul.msk.bf16.vlgmr.msrb.gmra.mxu3 %vm1589_vm13, %v1195_v22  ;;  %v1198_v17 = vpack.c.bf16 %v707_v0, %v704_v31 }
 0x258   :  { %942 = vmatmul.bf16.gmra.mxu2 %v716_v27 }
 0x25c   :  { %1193 = vmatmul.msk.bf16.gmra.mxu1 %vm1608_vm0, %v1192_v47  ;;  %1199 = vmatmul.msk.bf16.gmra.mxu3 %vm1613_vm4, %v1198_v17 }
 0x2c9   :  { %v919_v51 = vpop.f32.mrf.mxu1 }
 0x2cb   :  { %v938_v32 = vpop.f32.mrf.mxu2 }
 0x2cc   :  { %v939_v1 = vadd.f32 %v938_v32, %v919_v51 }
 0x2cf   :  { %v957_v33 = vpop.f32.mrf.mxu3 }
 0x2d0   :  { %v958_v36 = vadd.f32 %v957_v33, %v939_v1 }
 0x2d1   :  { %v921_v18 = vpop.f32.mrf.mxu1 }
 0x2d2   :  { %v968_v2 = vadd.f32 %v1257_v35, %v958_v36 }
 0x2d3   :  { %v940_v3 = vpop.f32.mrf.mxu2 }
 0x2d4   :  { %v972_v37 = vadd.f32 %v968_v2, %v1348_v5  ;;  %v941_v4 = vadd.f32 %v940_v3, %v921_v18 }
 0x2d6   :  { %976 = vst [vmem:[%s1788_s6] sm:$0xff] %v972_v37 }
 0x2d7   :  { %v959_v9 = vpop.f32.mrf.mxu3 }
 0x2d8   :  { %v960_v11 = vadd.f32 %v959_v9, %v941_v4 }
 0x2d9   :  { %v924_v41 = vpop.f32.mrf.mxu1 }
 0x2da   :  { %v969_v14 = vadd.f32 %v1257_v35, %v960_v11 }
 0x2db   :  { %v943_v15 = vpop.f32.mrf.mxu2 }
 0x2dc   :  { %v973_v16 = vadd.f32 %v969_v14, %v1353_v6  ;;  %v944_v19 = vadd.f32 %v943_v15, %v924_v41 }
 0x2de   :  { %977 = vst [vmem:[%s1788_s6 + $0x8] sm:$0xff] %v973_v16 }
 0x2df   :  { %v962_v23 = vpop.f32.mrf.mxu3 }
 0x2e0   :  { %v963_v29 = vadd.f32 %v962_v23, %v944_v19 }
 0x2e1   :  { %v926_v34 = vpop.f32.mrf.mxu1 }
 0x2e2   :  { %v970_v5 = vadd.f32 %v1257_v35, %v963_v29 }
 0x2e3   :  { %v945_v38 = vpop.f32.mrf.mxu2 }
 0x2e4   :  { %v974_v39 = vadd.f32 %v970_v5, %v1358_v7  ;;  %v946_v40 = vadd.f32 %v945_v38, %v926_v34 }
 0x2e6   :  { %978 = vst [vmem:[%s1788_s6 + $0x10] sm:$0xff] %v974_v39 }
 0x2e7   :  { %v964_v42 = vpop.f32.mrf.mxu3 }
 0x2e8   :  { %v965_v43 = vadd.f32 %v964_v42, %v946_v40 }
 0x2ea   :  { %v971_v6 = vadd.f32 %v1257_v35, %v965_v43 }
 0x2ec   :  { %v975_v44 = vadd.f32 %v971_v6, %v1363_v8 }
 0x2ee   :  { %979 = vst [vmem:[%s1788_s6 + $0x18] sm:$0xff] %v975_v44 }

</bundles_post_ra>
